<compile_context>
chip_gen: v7x
topology: tpu7x:2x2x1
jax: 0.10.0
libtpu: 0.0.40
codegen_flags: <defaults>
</compile_context>

<pallas_src>
import functools

import jax
import jax.numpy as jnp
from jax.experimental import pallas as pl
from jax.experimental.pallas import tpu as pltpu


# -----------------------------------------------------------------------------
# Kernels
# -----------------------------------------------------------------------------
def _replicator_kernel(wt_ref, p_ref, o_ref):
    """One replicator-derivative evaluation for a (tb, E) tile of states.

    wt_ref: (E, E) bf16 VMEM   -- W transposed, so f = p @ Wt == (W @ p) rows
    p_ref : (tb, E) f32 VMEM
    o_ref : (tb, E) f32 VMEM
    """
    p = p_ref[...]                                         # (tb, E) f32
    f = jnp.dot(p.astype(jnp.bfloat16), wt_ref[...],
                preferred_element_type=jnp.float32)        # MXU, f32 accumulate
    s = jnp.sum(p * f, axis=-1, keepdims=True)             # (tb, 1)  p . f
    o_ref[...] = p * (f - s)                               # f32 elementwise


def _euler_kernel(wt_ref, p0_ref, o_ref, *, n_steps, dt):
    """n_steps fused explicit-Euler replicator steps; W loaded once."""
    wt = wt_ref[...]                                       # (E, E) bf16, resident

    def step(_, p):
        f = jnp.dot(p.astype(jnp.bfloat16), wt,
                    preferred_element_type=jnp.float32)
        s = jnp.sum(p * f, axis=-1, keepdims=True)
        return p + dt * (p * (f - s))

    o_ref[...] = jax.lax.fori_loop(0, n_steps, step, p0_ref[...], unroll=True)


# -----------------------------------------------------------------------------
# Wrappers
# -----------------------------------------------------------------------------
def _prep_wt(W):
    # Static layer weight: transpose + bf16 cast once in the wrapper (amortized).
    return jnp.asarray(W, jnp.float32).T.astype(jnp.bfloat16)


def fitness_forward(W, p, t=0.0):
    """Module-equivalent forward(t, p): W (E,E), p (E,) -> p_dot (E,)."""
    del t  # unused, mirrors the PyTorch signature
    E = W.shape[0]
    out = pl.pallas_call(
        _replicator_kernel,
        out_shape=jax.ShapeDtypeStruct((1, E), jnp.float32),
        in_specs=[
            pl.BlockSpec(memory_space=pltpu.MemorySpace.VMEM),   # W.T (bf16)
            pl.BlockSpec(memory_space=pltpu.MemorySpace.VMEM),   # p row
        ],
        out_specs=pl.BlockSpec(memory_space=pltpu.MemorySpace.VMEM),
    )(_prep_wt(W), jnp.asarray(p, jnp.float32).reshape(1, E))
    return out.reshape(E)


def fitness_forward_batch(W, P, tb=8):
    """B independent states in one call: W (E,E), P (B,E) -> P_dot (B,E)."""
    B, E = P.shape
    Bp = ((B + tb - 1) // tb) * tb                 # pad batch to f32 sublane (8)
    Pf = jnp.asarray(P, jnp.float32)
    if Bp != B:
        Pf = jnp.pad(Pf, ((0, Bp - B), (0, 0)))
    out = pl.pallas_call(
        _replicator_kernel,
        out_shape=jax.ShapeDtypeStruct((Bp, E), jnp.float32),
        grid=(Bp // tb,),
        in_specs=[
            pl.BlockSpec((E, E), lambda i: (0, 0)),    # constant index -> W resident
            pl.BlockSpec((tb, E), lambda i: (i, 0)),
        ],
        out_specs=pl.BlockSpec((tb, E), lambda i: (i, 0)),
        compiler_params=pltpu.CompilerParams(
            dimension_semantics=("parallel",)),        # shard batch across v7x cores
    )(_prep_wt(W), Pf)
    return out[:B]


def fitness_integrate(W, p0, n_steps, dt):
    """n_steps Euler replicator steps fused in one pallas_call; returns p(T)."""
    E = W.shape[0]
    kernel = functools.partial(_euler_kernel, n_steps=n_steps, dt=dt)
    out = pl.pallas_call(
        kernel,
        out_shape=jax.ShapeDtypeStruct((1, E), jnp.float32),
        in_specs=[
            pl.BlockSpec(memory_space=pltpu.MemorySpace.VMEM),
            pl.BlockSpec(memory_space=pltpu.MemorySpace.VMEM),
        ],
        out_specs=pl.BlockSpec(memory_space=pltpu.MemorySpace.VMEM),
    )(_prep_wt(W), jnp.asarray(p0, jnp.float32).reshape(1, E))
    return out.reshape(E)


# -----------------------------------------------------------------------------
# Demo / correctness check
# -----------------------------------------------------------------------------
if __name__ == "__main__":
    E, B = 128, 16
    key = jax.random.PRNGKey(0)
    kw, kp, kb = jax.random.split(key, 3)

    # xavier_uniform((E, E)): bound = sqrt(1 / E)
    bound = (1.0 / E) ** 0.5
    W = jax.random.uniform(kw, (E, E), jnp.float32, minval=-bound, maxval=bound)
    p = jax.random.uniform(kp, (E,), jnp.float32)
    P = jax.random.uniform(kb, (B, E), jnp.float32)

    # --- single-state forward (exact module semantics) ---
    p_dot = jax.block_until_ready(fitness_forward(W, p))
    f_ref = W @ p
    ref = p * (f_ref - jnp.dot(p, f_ref))
    assert jnp.allclose(p_dot, ref, atol=2e-2, rtol=2e-2), \
        "single forward mismatch (bf16 weights vs f32 reference)"

    # --- batched forward: B states, one call, W resident across the grid ---
    P_dot = jax.block_until_ready(fitness_forward_batch(W, P))
    F = P @ W.T
    Ref = P * (F - jnp.sum(P * F, axis=-1, keepdims=True))
    assert jnp.allclose(P_dot, Ref, atol=2e-2, rtol=2e-2), \
        "batched forward mismatch"

    # --- fused Euler integration: N replicator steps in one pallas_call ---
    n_steps, dt = 16, 1e-2
    p_T = jax.block_until_ready(fitness_integrate(W, p, n_steps, dt))
    # Reference uses the same bf16-cast weights the kernel sees (f32 accumulate).
    Wt32 = W.T.astype(jnp.bfloat16).astype(jnp.float32)
    pr = p.reshape(1, E)
    for _ in range(n_steps):
        pb = pr.astype(jnp.bfloat16).astype(jnp.float32)
        fr = pb @ Wt32
        sr = jnp.sum(pr * fr, axis=-1, keepdims=True)
        pr = pr + dt * (pr * (fr - sr))
    assert jnp.allclose(p_T, pr.reshape(E), atol=1e-3, rtol=1e-3), \
        "fused Euler integration mismatch"

    print("KERNEL_OK")
</pallas_src>

<mosaic_0001>
module attributes {stable_mosaic.version = 11 : i64} {
  func.func @_replicator_kernel(%arg0: memref<128x128xbf16, #tpu.memory_space<vmem>>, %arg1: memref<1x128xf32, #tpu.memory_space<vmem>>, %arg2: memref<1x128xf32, #tpu.memory_space<vmem>>) attributes {dimension_semantics = [], scalar_prefetch = 0 : i64, scratch_operands = 0 : i64, tpu.core_type = #tpu.core_type<tc>} {
    %c0 = arith.constant 0 : index
    %c0_0 = arith.constant 0 : index
    %0 = vector.load %arg1[%c0, %c0_0] : memref<1x128xf32, #tpu.memory_space<vmem>>, vector<1x128xf32>
    %1 = arith.truncf %0 : vector<1x128xf32> to vector<1x128xbf16>
    %c0_1 = arith.constant 0 : index
    %c0_2 = arith.constant 0 : index
    %2 = vector.load %arg0[%c0_1, %c0_2] : memref<128x128xbf16, #tpu.memory_space<vmem>>, vector<128x128xbf16>
    %cst = arith.constant dense<0.000000e+00> : vector<1x128xf32>
    %3 = tpu.matmul %1, %2, %cst {dimension_numbers = #tpu.dot_dimension_numbers<[1], [0], [0], [1], [0, 0, 1, 1], [], []>} : vector<1x128xbf16>, vector<128x128xbf16>, vector<1x128xf32> -> vector<1x128xf32>
    %4 = arith.mulf %0, %3 : vector<1x128xf32>
    %cst_3 = arith.constant dense<0.000000e+00> : vector<1xf32>
    %5 = vector.multi_reduction <add>, %4, %cst_3 [1] : vector<1x128xf32> to vector<1xf32>
    %6 = vector.shape_cast %5 : vector<1xf32> to vector<1x1xf32>
    %7 = vector.broadcast %6 : vector<1x1xf32> to vector<1x128xf32>
    %8 = arith.subf %3, %7 : vector<1x128xf32>
    %9 = arith.mulf %0, %8 : vector<1x128xf32>
    %c0_4 = arith.constant 0 : index
    %c0_5 = arith.constant 0 : index
    %10 = vector.load %arg2[%c0_4, %c0_5] : memref<1x128xf32, #tpu.memory_space<vmem>>, vector<1x128xf32>
    tpu.vector_store %arg2[%c0_4, %c0_5], %9 {strides = array<i32>} : memref<1x128xf32, #tpu.memory_space<vmem>>, vector<1x128xf32>,
    return
  }
}

</mosaic_0001>

<bundles_post_ra>
// kernel: tpu_custom_call.1
= control target key start
LH: loop header
LB: loop body
LE: loop exit
PB: predicated region body
PF: predicated region fallthrough
CT: control target
= control target key end

     0   :  { %7 = vsyncpa [#allocation3], 0  ;;  %s303_s0 = inlined_call_operand.hbm [shape: bf16[128,128], index: 0, kind: input, shape index: {}]   ;;  %s304_s1 = inlined_call_operand.vmem [shape: f32[1,128], index: 1, kind: input, shape index: {}]   ;;  %s305_s2 = inlined_call_operand.hbm [shape: f32[1,128], index: 2, kind: output, shape index: {}]  }
   0x1   :  { %8 = vsyncpa [#allocation4], 0  ;;  %s255_s9 = smov [#allocation2]   ;;  %s207_s13 = scalar_lea.hbm %s303_s0, 1024 }
   0x2   :  { %s14_s10 = sshll.u32 %s255_s9, 4  ;;  %p208_p0 = scmp.ne.s32.totalorder %s303_s0, %s207_s13  ;;  %s15_s10 = int_to_ptr.vmem [resolvable:$true] %s14_s10 }
   0x3   :  { %p211_p1 = scmp.lt.u32.totalorder %s207_s13, %s303_s0 }
   0x5   :  { %p213_p2 = pnand %p211_p1, %p208_p0 }
   0x7   :  { %216 = shalt.err (!%p213_p2)
}
   0x8   :  { %s217_s18 = scalar_lea.vmem %s15_s10, 1024  ;;  %p222_p4 = scmp.lt.s32.totalorder %s15_s10, %s15_s10 }
   0x9   :  { %p218_p3 = scmp.ne.s32.totalorder %s15_s10, %s217_s18  ;;  %p223_p5 = scmp.lt.s32.totalorder %s217_s18, %s217_s18 }
   0xb   :  { %p224_p6 = por %p223_p5, %p222_p4 }
   0xd   :  { %p225_p7 = pnand %p224_p6, %p218_p3 }
   0xf   :  { %228 = shalt.err (!%p225_p7)
}
  0x10   :  { %s256_s19 = smov 64   ;;  %s257_s20 = smov 4  }
  0x11   :  { %20 = dma.hbm_to_vmem [thread:$0]  %s303_s0, 1024, %s15_s10, [#allocation3], %s256_s19, %s256_s19, %s257_s20  }
  0x12   :  { %251 = dma.done.wait [#allocation3], 1024  }
  0x13   :  { %252 = vsyncadd [#allocation3], 4294966272  ;;  %v258_v0 = vmov 0.0   ;;  %vm259_vm0 = vmmov 0   ;;  %v199_v1 = vld [vmem:[#allocation2] sm:$0xff]   ;;  %v200_v2 = vld [vmem:[#allocation2 + $0x8] sm:$0xff]  }
  0x14   :  { %173 = vmatprep.subr.bf16.mxu0 %v258_v0  ;;  %189 = vmatprep.mubr.msk.bf16.mxu0 %vm259_vm0, %v258_v0  ;;  %v201_v3 = vld [vmem:[#allocation2 + $0x10] sm:$0xff]   ;;  %v202_v4 = vld [vmem:[#allocation2 + $0x18] sm:$0xff]   ;;  %v203_v5 = vld [vmem:[#allocation2 + $0x20] sm:$0xff]   ;;  %vm134_vm1 = vcmask 1040384   ;;  %s260_s24 = smov [#allocation5]  }
  0x15   :  { %174 = vmatpush3.bf16.msra.mxu0 %v199_v1  ;;  %v204_v6 = vld [vmem:[#allocation2 + $0x28] sm:$0xff]   ;;  %v205_v7 = vld [vmem:[#allocation2 + $0x30] sm:$0xff]   ;;  %v206_v8 = vld [vmem:[#allocation2 + $0x38] sm:$0xff]   ;;  %s147_s25 = sshll.u32 %s260_s24, 4  ;;  %s148_s25 = int_to_ptr.vmem [resolvable:$true] %s147_s25 }
  0x16   :  { %175 = vmatprep.subr.bf16.mxu0 %v258_v0  ;;  %v27_v9 = vld [vmem:[%s304_s1] sm:$0x1]  ;;  %s229_s1 = scalar_lea.vmem %s148_s25, 16  ;;  %s233_s26 = scalar_lea.vmem %s148_s25, 32 }
  0x17   :  { %v28_v10 = vpack.c.bf16 %v27_v9, %v27_v9  ;;  %p230_p8 = scmp.ne.s32.totalorder %s148_s25, %s229_s1  ;;  %p234_p9 = scmp.lt.s32.totalorder %s148_s25, %s148_s25 }
  0x18   :  { %p235_p10 = scmp.lt.s32.totalorder %s233_s26, %s229_s1 }
  0x19   :  { %176 = vmatpush3.bf16.msra.mxu0 %v200_v2 }
  0x1a   :  { %177 = vmatprep.subr.bf16.mxu0 %v258_v0  ;;  %p236_p11 = por %p235_p10, %p234_p9 }
  0x1c   :  { %p237_p12 = pnand %p236_p11, %p230_p8 }
  0x1d   :  { %178 = vmatpush3.bf16.msra.mxu0 %v201_v3 }
  0x1e   :  { %179 = vmatprep.subr.bf16.mxu0 %v258_v0 }
  0x21   :  { %180 = vmatpush3.bf16.msra.mxu0 %v202_v4 }
  0x22   :  { %181 = vmatprep.subr.bf16.mxu0 %v258_v0 }
  0x25   :  { %182 = vmatpush3.bf16.msra.mxu0 %v203_v5 }
  0x26   :  { %183 = vmatprep.subr.bf16.mxu0 %v258_v0 }
  0x29   :  { %184 = vmatpush3.bf16.msra.mxu0 %v204_v6 }
  0x2a   :  { %185 = vmatprep.subr.bf16.mxu0 %v258_v0 }
  0x2d   :  { %186 = vmatpush3.bf16.msra.mxu0 %v205_v7 }
  0x2e   :  { %187 = vmatprep.subr.bf16.mxu0 %v258_v0 }
  0x31   :  { %188 = vmatpush3.bf16.msra.mxu0 %v206_v8 }
  0x34   :  { %190 = vmatmul.mubr.bf16.vlgmr.msra.gmra.mrb[0].mxu0 %v28_v10 }
 0x107   :  { %v127_v11 = vpop.f32.mrb[0].mxu0 }
 0x108   :  { %v191_v12 = vpop.f32.mrb[1].mxu0  ;;  %v133_v13 = vmul.f32 %v127_v11, %v27_v9 }
 0x109   :  { %v130_v14 = vpop.f32.mrb[2].mxu0 }
 0x10a   :  { %v192_v15 = vpop.f32.mrb[3].mxu0  ;;  %v135_v16 = vsel %vm134_vm1, %v133_v13, 0.0 }
 0x10b   :  { %136 = vadd.xlane.f32.xlu0 %v135_v16 }
 0x198   :  { %v137_v17 = vpop.xlane.xlu0 %136 }
 0x199   :  { %v138_v18 = vsub.f32 %v127_v11, %v137_v17 }
 0x19b   :  { %v139_v19 = vmul.f32 %v138_v18, %v27_v9 }
 0x19d   :  { %140 = vst [vmem:[#allocation5] sm:$0x1] %v139_v19 }
 0x19e   :  { %240 = shalt.err (!%p237_p12)
}
 0x19f   :  { %s241_s29 = scalar_lea.hbm %s305_s2, 16 }
 0x1a0   :  { %p242_p13 = scmp.ne.s32.totalorder %s305_s2, %s241_s29  ;;  %p245_p0 = scmp.lt.u32.totalorder %s241_s29, %s305_s2 }
 0x1a2   :  { %p247_p1 = pnand %p245_p0, %p242_p13 }
 0x1a4   :  { %250 = shalt.err (!%p247_p1)
}
 0x1a5   :  { %150 = dma.vmem_to_hbm [thread:$0]  %s148_s25, 16, %s305_s2, [#allocation4]  }
 0x1a6   :  { %253 = dma.done.wait [#allocation4], 16  }
 0x1a7   :  { %254 = vsyncadd [#allocation4], 4294967280 }
 0x1a8   :  { %154 = vsyncpa [#allocation3], 1 }
 0x1a9   :  { %155 = vsyncpa [#allocation4], 1 }

</bundles_post_ra>
